<compile_context>
chip_gen: v7x
topology: tpu7x:2x2x1
jax: 0.10.0
libtpu: 0.0.40
codegen_flags: <defaults>
</compile_context>

<pallas_src>
import jax
import jax.numpy as jnp
from jax.experimental import pallas as pl
from jax.experimental.pallas import tpu as pltpu

IN_DIM = 7
IN_AUG = 8           # 7 features + constant-1.0 bias row
H1, H2, H3 = 32, 128, 32
OUT_DIM = 1

MAX_BT = 16384                     # keeps live VMEM well under the scoped cap below
VMEM_CAP_BYTES = 48 * 1024 * 1024  # safe on v7x (64 MiB/TC) and v5e/v6e (128 MiB)
PER_COL_BYTES = 3 * 1024           # conservative live-VMEM estimate per batch column


def _round_up(x, m):
    return (x + m - 1) // m * m


def _default_epilogue_dtype():
    """bf16 bias/ReLU epilogue on chips with a bf16 VPU (v6e/v7x); f32 otherwise."""
    try:
        kind = jax.devices()[0].device_kind.lower()
    except Exception:
        return jnp.float32
    if any(t in kind for t in ("v2", "v3", "v4", "v5")):
        return jnp.float32
    return jnp.bfloat16


def _make_kernel(epi_dtype):
    bf16 = jnp.bfloat16

    def kernel(x_ref,             # (8, bt)  bf16, row 7 == 1.0 (bias row)
               w1_ref,            # (H1, 8)  bf16, column 7 == b1
               w2_ref, b2_ref,    # (H2, H1) bf16, (H2, 1) epi_dtype
               w3_ref, b3_ref,    # (H3, H2) bf16, (H3, 1) epi_dtype
               w4_ref, b4_ref,    # (H3, 1)  f32 (pre-transposed), (1, 1) f32
               o_ref):            # (1, bt)  f32
        x = x_ref[...]

        # Layer 1 (bias folded into w1): (H1, 8) @ (8, bt) -> (H1, bt), f32 acc.
        a = jnp.dot(w1_ref[...], x, preferred_element_type=jnp.float32)
        h = jnp.maximum(a.astype(epi_dtype), 0.0).astype(bf16)

        # Layer 2: (H2, H1) @ (H1, bt) -> (H2, bt).
        a = jnp.dot(w2_ref[...], h, preferred_element_type=jnp.float32)
        h = jnp.maximum(a.astype(epi_dtype) + b2_ref[...], 0.0).astype(bf16)

        # Layer 3: (H3, H2) @ (H2, bt) -> (H3, bt).
        a = jnp.dot(w3_ref[...], h, preferred_element_type=jnp.float32)
        h = jnp.maximum(a.astype(epi_dtype) + b3_ref[...], 0.0)

        # Layer 4 (32 -> 1) on VPU + sublane reduce instead of a near-empty MXU pass:
        # out[0, :] = sum_k w4[k] * h[k, :] + b4   (f32)
        out = jnp.sum(h.astype(jnp.float32) * w4_ref[...], axis=0, keepdims=True) \
            + b4_ref[...]
        o_ref[...] = out.astype(o_ref.dtype)

    return kernel


def aftershock_classifier(x, params, *, batch_tile=8192, epilogue_dtype=None):
    """Forward pass of AftershockClassifier.

    x:      (B, 7) float32
    params: PyTorch-layout params: w{1..4} shaped (out, in), b{1..4} shaped (out,)
    returns (B, 1) float32
    """
    B, D = x.shape
    assert D == IN_DIM

    epi = epilogue_dtype if epilogue_dtype is not None else _default_epilogue_dtype()

    # ---- Batch tile selection -------------------------------------------------
    bt = _round_up(max(int(batch_tile), 128), 128)
    bt = min(bt, MAX_BT)
    B_pad_min = _round_up(B, 128)
    bt = min(bt, B_pad_min)
    # Keep >= 2 grid steps whenever there is enough work: v7x has 2 TensorCores
    # and the "parallel" grid axis is what shards steps across them.
    if B_pad_min >= 256:
        bt = min(bt, _round_up((B_pad_min + 1) // 2, 128))
    bt = max(bt, 128)
    B_pad = _round_up(B, bt)
    grid = (B_pad // bt,)

    # VMEM budget derived from bt (resident weights are ~40 KB, dominated by the
    # per-column activations / double-buffered I/O).
    vmem_limit = int(min(VMEM_CAP_BYTES, max(32 * 1024 * 1024, PER_COL_BYTES * bt)))

    # ---- Host-side operand prep -----------------------------------------------
    # Feature-major layout (features, batch); append a constant-1.0 row so b1 can
    # be folded into W1 as an extra column; zero-pad along batch.
    x_t = jnp.concatenate([x.T, jnp.ones((1, B), x.dtype)], axis=0)
    x_t = jnp.pad(x_t.astype(jnp.bfloat16), ((0, 0), (0, B_pad - B)))

    w1 = jnp.concatenate(
        [params["w1"], params["b1"].reshape(H1, 1)], axis=1).astype(jnp.bfloat16)  # (H1, 8)
    w2 = params["w2"].astype(jnp.bfloat16)                                          # (H2, H1)
    w3 = params["w3"].astype(jnp.bfloat16)                                          # (H3, H2)
    b2 = params["b2"].reshape(H2, 1).astype(epi)
    b3 = params["b3"].reshape(H3, 1).astype(epi)
    w4t = params["w4"].reshape(OUT_DIM, H3).T.astype(jnp.float32)                    # (H3, 1)
    b4 = params["b4"].reshape(1, 1).astype(jnp.float32)

    def full(shape):
        # Grid-invariant full-array block (weights/biases stay resident in VMEM).
        return pl.BlockSpec(shape, lambda i: (0, 0))

    in_specs = [
        pl.BlockSpec((IN_AUG, bt), lambda i: (0, i)),   # x tile (batch on lanes)
        full((H1, IN_AUG)),
        full((H2, H1)), full((H2, 1)),
        full((H3, H2)), full((H3, 1)),
        full((H3, 1)),  full((1, 1)),
    ]
    out_spec = pl.BlockSpec((1, bt), lambda i: (0, i))  # lane-dense output slab

    out_pad = pl.pallas_call(
        _make_kernel(epi),
        out_shape=jax.ShapeDtypeStruct((1, B_pad), jnp.float32),
        grid_spec=pltpu.PrefetchScalarGridSpec(
            num_scalar_prefetch=0,
            grid=grid,
            in_specs=in_specs,
            out_specs=out_spec,
        ),
        compiler_params=pltpu.CompilerParams(
            dimension_semantics=("parallel",),
            vmem_limit_bytes=vmem_limit,
        ),
    )(x_t, w1, w2, b2, w3, b3, w4t, b4)

    return out_pad[:, :B].T  # (B, 1)


def init_params(key):
    """PyTorch nn.Linear default init: U[-1/sqrt(fan_in), 1/sqrt(fan_in)], (out,in) weights."""
    dims = [(IN_DIM, H1), (H1, H2), (H2, H3), (H3, OUT_DIM)]
    params = {}
    keys = jax.random.split(key, 2 * len(dims))
    for idx, (fan_in, fan_out) in enumerate(dims):
        bound = 1.0 / jnp.sqrt(fan_in)
        w = jax.random.uniform(keys[2 * idx], (fan_out, fan_in),
                               minval=-bound, maxval=bound, dtype=jnp.float32)
        b = jax.random.uniform(keys[2 * idx + 1], (fan_out,),
                               minval=-bound, maxval=bound, dtype=jnp.float32)
        params[f"w{idx + 1}"] = w
        params[f"b{idx + 1}"] = b
    return params


def _reference(x, p, epi_dtype):
    """Precision-matched reference: bf16 MXU operands, f32 accumulate, epi-dtype
    bias/ReLU for layers 1-3 (b1 folded in bf16), f32 final layer."""
    bf = jnp.bfloat16
    h = x.astype(bf)
    a = jnp.dot(h, p["w1"].astype(bf).T, preferred_element_type=jnp.float32) \
        + p["b1"].astype(bf).astype(jnp.float32)
    h = jnp.maximum(a.astype(epi_dtype), 0.0).astype(bf)
    a = jnp.dot(h, p["w2"].astype(bf).T, preferred_element_type=jnp.float32)
    h = jnp.maximum(a.astype(epi_dtype) + p["b2"].astype(epi_dtype), 0.0).astype(bf)
    a = jnp.dot(h, p["w3"].astype(bf).T, preferred_element_type=jnp.float32)
    h = jnp.maximum(a.astype(epi_dtype) + p["b3"].astype(epi_dtype), 0.0)
    return jnp.dot(h.astype(jnp.float32), p["w4"].astype(jnp.float32).T) + p["b4"]


if __name__ == "__main__":
    key = jax.random.PRNGKey(0)
    k_params, k_x1, k_x2 = jax.random.split(key, 3)
    params = init_params(k_params)
    epi = _default_epilogue_dtype()

    # Small batch (exercises 8 -> 128 lane padding, single grid step).
    batch = 8
    x = jax.random.normal(k_x1, (batch, IN_DIM), dtype=jnp.float32)
    fwd = jax.jit(lambda xx: aftershock_classifier(xx, params, epilogue_dtype=epi))
    out = jax.block_until_ready(fwd(x))
    ref = _reference(x, params, epi)
    assert out.shape == (batch, 1)
    assert jnp.allclose(out, ref, atol=2e-2, rtol=2e-2), "mismatch vs reference (batch=8)"

    # Non-multiple-of-128 batch -> >= 2 pipelined grid steps (megacore-shardable).
    batch2 = 333
    x2 = jax.random.normal(k_x2, (batch2, IN_DIM), dtype=jnp.float32)
    fwd2 = jax.jit(lambda xx: aftershock_classifier(xx, params, batch_tile=256,
                                                    epilogue_dtype=epi))
    out2 = jax.block_until_ready(fwd2(x2))
    ref2 = _reference(x2, params, epi)
    assert out2.shape == (batch2, 1)
    assert jnp.allclose(out2, ref2, atol=2e-2, rtol=2e-2), "mismatch vs reference (batch=333)"

    print("KERNEL_OK")
</pallas_src>

<mosaic_0001>
module attributes {stable_mosaic.version = 11 : i64} {
  func.func @kernel(%arg0: i32, %arg1: memref<8x128xbf16, #tpu.memory_space<vmem>>, %arg2: memref<32x8xbf16, #tpu.memory_space<vmem>>, %arg3: memref<128x32xbf16, #tpu.memory_space<vmem>>, %arg4: memref<128x1xbf16, #tpu.memory_space<vmem>>, %arg5: memref<32x128xbf16, #tpu.memory_space<vmem>>, %arg6: memref<32x1xbf16, #tpu.memory_space<vmem>>, %arg7: memref<32x1xf32, #tpu.memory_space<vmem>>, %arg8: memref<1x1xf32, #tpu.memory_space<vmem>>, %arg9: memref<1x128xf32, #tpu.memory_space<vmem>>) attributes {dimension_semantics = [#tpu.dimension_semantics<parallel>], iteration_bounds = array<i64: 1>, scalar_prefetch = 0 : i64, scratch_operands = 0 : i64, tpu.core_type = #tpu.core_type<tc>, window_params = [{transform_indices = @transform_0, window_bounds = array<i64: 8, 128>}, {pipeline_mode = #tpu.pipeline_mode<synchronous>, transform_indices = @transform_1, window_bounds = array<i64: 32, 8>}, {pipeline_mode = #tpu.pipeline_mode<synchronous>, transform_indices = @transform_2, window_bounds = array<i64: 128, 32>}, {pipeline_mode = #tpu.pipeline_mode<synchronous>, transform_indices = @transform_3, window_bounds = array<i64: 128, 1>}, {pipeline_mode = #tpu.pipeline_mode<synchronous>, transform_indices = @transform_4, window_bounds = array<i64: 32, 128>}, {pipeline_mode = #tpu.pipeline_mode<synchronous>, transform_indices = @transform_5, window_bounds = array<i64: 32, 1>}, {pipeline_mode = #tpu.pipeline_mode<synchronous>, transform_indices = @transform_6, window_bounds = array<i64: 32, 1>}, {pipeline_mode = #tpu.pipeline_mode<synchronous>, transform_indices = @transform_7, window_bounds = array<i64: 1, 1>}, {transform_indices = @transform_8, window_bounds = array<i64: 1, 128>}]} {
    %c0 = arith.constant 0 : index
    %c0_0 = arith.constant 0 : index
    %0 = vector.load %arg1[%c0, %c0_0] : memref<8x128xbf16, #tpu.memory_space<vmem>>, vector<8x128xbf16>
    %c0_1 = arith.constant 0 : index
    %c0_2 = arith.constant 0 : index
    %1 = vector.load %arg2[%c0_1, %c0_2] : memref<32x8xbf16, #tpu.memory_space<vmem>>, vector<32x8xbf16>
    %cst = arith.constant dense<0.000000e+00> : vector<32x128xf32>
    %2 = tpu.matmul %1, %0, %cst {dimension_numbers = #tpu.dot_dimension_numbers<[1], [0], [0], [1], [0, 0, 1, 1], [], []>} : vector<32x8xbf16>, vector<8x128xbf16>, vector<32x128xf32> -> vector<32x128xf32>
    %3 = arith.truncf %2 : vector<32x128xf32> to vector<32x128xbf16>
    %cst_3 = arith.constant 0.000000e+00 : bf16
    %4 = vector.broadcast %cst_3 : bf16 to vector<32x128xbf16>
    %5 = arith.maximumf %3, %4 : vector<32x128xbf16>
    %c0_4 = arith.constant 0 : index
    %c0_5 = arith.constant 0 : index
    %6 = vector.load %arg3[%c0_4, %c0_5] : memref<128x32xbf16, #tpu.memory_space<vmem>>, vector<128x32xbf16>
    %cst_6 = arith.constant dense<0.000000e+00> : vector<128x128xf32>
    %7 = tpu.matmul %6, %5, %cst_6 {dimension_numbers = #tpu.dot_dimension_numbers<[1], [0], [0], [1], [0, 0, 1, 1], [], []>} : vector<128x32xbf16>, vector<32x128xbf16>, vector<128x128xf32> -> vector<128x128xf32>
    %8 = arith.truncf %7 : vector<128x128xf32> to vector<128x128xbf16>
    %c0_7 = arith.constant 0 : index
    %c0_8 = arith.constant 0 : index
    %9 = vector.load %arg4[%c0_7, %c0_8] : memref<128x1xbf16, #tpu.memory_space<vmem>>, vector<128x1xbf16>
    %10 = vector.broadcast %9 : vector<128x1xbf16> to vector<128x128xbf16>
    %11 = arith.addf %8, %10 : vector<128x128xbf16>
    %cst_9 = arith.constant 0.000000e+00 : bf16
    %12 = vector.broadcast %cst_9 : bf16 to vector<128x128xbf16>
    %13 = arith.maximumf %11, %12 : vector<128x128xbf16>
    %c0_10 = arith.constant 0 : index
    %c0_11 = arith.constant 0 : index
    %14 = vector.load %arg5[%c0_10, %c0_11] : memref<32x128xbf16, #tpu.memory_space<vmem>>, vector<32x128xbf16>
    %cst_12 = arith.constant dense<0.000000e+00> : vector<32x128xf32>
    %15 = tpu.matmul %14, %13, %cst_12 {dimension_numbers = #tpu.dot_dimension_numbers<[1], [0], [0], [1], [0, 0, 1, 1], [], []>} : vector<32x128xbf16>, vector<128x128xbf16>, vector<32x128xf32> -> vector<32x128xf32>
    %16 = arith.truncf %15 : vector<32x128xf32> to vector<32x128xbf16>
    %c0_13 = arith.constant 0 : index
    %c0_14 = arith.constant 0 : index
    %17 = vector.load %arg6[%c0_13, %c0_14] : memref<32x1xbf16, #tpu.memory_space<vmem>>, vector<32x1xbf16>
    %18 = vector.broadcast %17 : vector<32x1xbf16> to vector<32x128xbf16>
    %19 = arith.addf %16, %18 : vector<32x128xbf16>
    %cst_15 = arith.constant 0.000000e+00 : bf16
    %20 = vector.broadcast %cst_15 : bf16 to vector<32x128xbf16>
    %21 = arith.maximumf %19, %20 : vector<32x128xbf16>
    %22 = arith.extf %21 : vector<32x128xbf16> to vector<32x128xf32>
    %c0_16 = arith.constant 0 : index
    %c0_17 = arith.constant 0 : index
    %23 = vector.load %arg7[%c0_16, %c0_17] : memref<32x1xf32, #tpu.memory_space<vmem>>, vector<32x1xf32>
    %24 = vector.broadcast %23 : vector<32x1xf32> to vector<32x128xf32>
    %25 = arith.mulf %22, %24 : vector<32x128xf32>
    %cst_18 = arith.constant dense<0.000000e+00> : vector<128xf32>
    %26 = vector.multi_reduction <add>, %25, %cst_18 [0] : vector<32x128xf32> to vector<128xf32>
    %27 = vector.shape_cast %26 : vector<128xf32> to vector<1x128xf32>
    %c0_19 = arith.constant 0 : index
    %c0_20 = arith.constant 0 : index
    %28 = vector.load %arg8[%c0_19, %c0_20] : memref<1x1xf32, #tpu.memory_space<vmem>>, vector<1x1xf32>
    %29 = vector.broadcast %28 : vector<1x1xf32> to vector<1x128xf32>
    %30 = arith.addf %27, %29 : vector<1x128xf32>
    %c0_21 = arith.constant 0 : index
    %c0_22 = arith.constant 0 : index
    %31 = vector.load %arg9[%c0_21, %c0_22] : memref<1x128xf32, #tpu.memory_space<vmem>>, vector<1x128xf32>
    tpu.vector_store %arg9[%c0_21, %c0_22], %30 {strides = array<i32>} : memref<1x128xf32, #tpu.memory_space<vmem>>, vector<1x128xf32>,
    return
  }
  func.func @transform_0(%arg0: i32) -> (i32, i32) {
    %c0_i32 = arith.constant 0 : i32
    %c0_i32_0 = arith.constant 0 : i32
    return %c0_i32, %arg0 : i32, i32
  }
  func.func @transform_1(%arg0: i32) -> (i32, i32) {
    %c0_i32 = arith.constant 0 : i32
    %c0_i32_0 = arith.constant 0 : i32
    %c0_i32_1 = arith.constant 0 : i32
    return %c0_i32, %c0_i32_0 : i32, i32
  }
  func.func @transform_2(%arg0: i32) -> (i32, i32) {
    %c0_i32 = arith.constant 0 : i32
    %c0_i32_0 = arith.constant 0 : i32
    %c0_i32_1 = arith.constant 0 : i32
    return %c0_i32, %c0_i32_0 : i32, i32
  }
  func.func @transform_3(%arg0: i32) -> (i32, i32) {
    %c0_i32 = arith.constant 0 : i32
    %c0_i32_0 = arith.constant 0 : i32
    %c0_i32_1 = arith.constant 0 : i32
    return %c0_i32, %c0_i32_0 : i32, i32
  }
  func.func @transform_4(%arg0: i32) -> (i32, i32) {
    %c0_i32 = arith.constant 0 : i32
    %c0_i32_0 = arith.constant 0 : i32
    %c0_i32_1 = arith.constant 0 : i32
    return %c0_i32, %c0_i32_0 : i32, i32
  }
  func.func @transform_5(%arg0: i32) -> (i32, i32) {
    %c0_i32 = arith.constant 0 : i32
    %c0_i32_0 = arith.constant 0 : i32
    %c0_i32_1 = arith.constant 0 : i32
    return %c0_i32, %c0_i32_0 : i32, i32
  }
  func.func @transform_6(%arg0: i32) -> (i32, i32) {
    %c0_i32 = arith.constant 0 : i32
    %c0_i32_0 = arith.constant 0 : i32
    %c0_i32_1 = arith.constant 0 : i32
    return %c0_i32, %c0_i32_0 : i32, i32
  }
  func.func @transform_7(%arg0: i32) -> (i32, i32) {
    %c0_i32 = arith.constant 0 : i32
    %c0_i32_0 = arith.constant 0 : i32
    %c0_i32_1 = arith.constant 0 : i32
    return %c0_i32, %c0_i32_0 : i32, i32
  }
  func.func @transform_8(%arg0: i32) -> (i32, i32) {
    %c0_i32 = arith.constant 0 : i32
    %c0_i32_0 = arith.constant 0 : i32
    return %c0_i32, %arg0 : i32, i32
  }
}

</mosaic_0001>

<bundles_post_ra>
// kernel: _lambda_.1
= control target key start
LH: loop header
LB: loop body
LE: loop exit
PB: predicated region body
PF: predicated region fallthrough
CT: control target
= control target key end

     0   :  { %s1298_s0 = inlined_call_operand.vmem [shape: bf16[8,128], index: 0, kind: input, shape index: {}]   ;;  %s1299_s1 = inlined_call_operand.hbm [shape: bf16[32,8], index: 1, kind: input, shape index: {}]   ;;  %s1300_s2 = inlined_call_operand.vmem [shape: bf16[128,32], index: 2, kind: input, shape index: {}]   ;;  %s1301_s3 = inlined_call_operand.hbm [shape: bf16[128,1], index: 3, kind: input, shape index: {}]   ;;  %s1302_s4 = inlined_call_operand.hbm [shape: bf16[32,128], index: 4, kind: input, shape index: {}]   ;;  %s1303_s5 = inlined_call_operand.hbm [shape: bf16[32,1], index: 5, kind: input, shape index: {}]   ;;  %s1304_s6 = inlined_call_operand.hbm [shape: f32[32,1], index: 6, kind: input, shape index: {}]   ;;  %s1305_s7 = inlined_call_operand.<no memory space> [shape: f32[1,1], index: 7, kind: input, shape index: {}]   ;;  %s1306_s8 = inlined_call_operand.vmem [shape: f32[1,128], index: 8, kind: output, shape index: {}]  }
   0x1   :  { %v13_v0 = vstv %s1305_s7 }
   0x2   :  { %14 = vst [vmem:[#allocation2] sm:$0x1] %v13_v0 }
   0x3   :  { %15 = vsyncpa [#allocation4], 0 }
   0x4   :  { %16 = vsyncpa [#allocation6], 0 }
   0x5   :  { %17 = vsyncpa [#allocation9], 0  ;;  %s1075_s29 = smov [#allocation5]   ;;  %s1076_s9 = smov [#allocation8]  }
   0x6   :  { %s39_s30 = sshll.u32 %s1075_s29, 4  ;;  %s63_s10 = sshll.u32 %s1076_s9, 4  ;;  %s40_s30 = int_to_ptr.vmem [resolvable:$true] %s39_s30  ;;  %s1134_s10 = int_to_ptr.vmem [resolvable:$true] %s63_s10 }
   0x7   :  { %s959_s13 = scalar_lea.hbm %s1301_s3, 1024 }
   0x8   :  { %p960_p0 = scmp.ne.s32.totalorder %s1301_s3, %s959_s13  ;;  %p963_p1 = scmp.lt.u32.totalorder %s959_s13, %s1301_s3 }
   0xa   :  { %p965_p2 = pnand %p963_p1, %p960_p0 }
   0xc   :  { %968 = shalt.err (!%p965_p2)
}
   0xd   :  { %s969_s17 = scalar_lea.vmem %s40_s30, 1024  ;;  %p974_p4 = scmp.lt.s32.totalorder %s40_s30, %s40_s30 }
   0xe   :  { %p970_p3 = scmp.ne.s32.totalorder %s40_s30, %s969_s17  ;;  %p975_p5 = scmp.lt.s32.totalorder %s969_s17, %s969_s17 }
  0x10   :  { %p976_p6 = por %p975_p5, %p974_p4 }
  0x12   :  { %p977_p7 = pnand %p976_p6, %p970_p3 }
  0x14   :  { %980 = shalt.err (!%p977_p7)
}
  0x15   :  { %s1077_s18 = smov 64   ;;  %s1078_s19 = smov 4  }
  0x16   :  { %45 = dma.hbm_to_vmem [thread:$0]  %s1301_s3, 1024, %s40_s30, [#allocation6], %s1077_s18, %s1077_s18, %s1078_s19  }
  0x17   :  { %s981_s24 = scalar_lea.hbm %s1303_s5, 256 }
  0x18   :  { %p982_p8 = scmp.ne.s32.totalorder %s1303_s5, %s981_s24  ;;  %p985_p9 = scmp.lt.u32.totalorder %s981_s24, %s1303_s5 }
  0x1a   :  { %p987_p10 = pnand %p985_p9, %p982_p8 }
  0x1c   :  { %990 = shalt.err (!%p987_p10)
}
  0x1d   :  { %s991_s29 = scalar_lea.vmem %s1134_s10, 256  ;;  %p996_p12 = scmp.lt.s32.totalorder %s1134_s10, %s1134_s10 }
  0x1e   :  { %p992_p11 = scmp.ne.s32.totalorder %s1134_s10, %s991_s29  ;;  %p997_p13 = scmp.lt.s32.totalorder %s991_s29, %s991_s29 }
  0x20   :  { %p998_p0 = por %p997_p13, %p996_p12 }
  0x22   :  { %p999_p1 = pnand %p998_p0, %p992_p11 }
  0x24   :  { %1002 = shalt.err (!%p999_p1)
}
  0x25   :  { %69 = dma.hbm_to_vmem [thread:$0]  %s1303_s5, 256, %s1134_s10, [#allocation9], %s1077_s18, %s1077_s18, %s1078_s19  }
  0x26   :  { %s1079_s9 = smov [#allocation3]   ;;  %s1080_s12 = smov [#allocation7]  }
  0x27   :  { %s25_s11 = sshll.u32 %s1079_s9, 4  ;;  %s51_s13 = sshll.u32 %s1080_s12, 4  ;;  %s26_s11 = int_to_ptr.vmem [resolvable:$true] %s25_s11  ;;  %s1171_s13 = int_to_ptr.vmem [resolvable:$true] %s51_s13 }
  0x28   :  { %s1003_s7 = scalar_lea.hbm %s1299_s1, 256 }
  0x29   :  { %p1004_p2 = scmp.ne.s32.totalorder %s1299_s1, %s1003_s7  ;;  %p1007_p3 = scmp.lt.u32.totalorder %s1003_s7, %s1299_s1 }
  0x2b   :  { %p1009_p4 = pnand %p1007_p3, %p1004_p2 }
  0x2d   :  { %1012 = shalt.err (!%p1009_p4)
}
  0x2e   :  { %s1013_s5 = scalar_lea.vmem %s26_s11, 256  ;;  %p1018_p6 = scmp.lt.s32.totalorder %s26_s11, %s26_s11 }
  0x2f   :  { %p1014_p5 = scmp.ne.s32.totalorder %s26_s11, %s1013_s5  ;;  %p1019_p7 = scmp.lt.s32.totalorder %s1013_s5, %s1013_s5 }
  0x31   :  { %p1020_p8 = por %p1019_p7, %p1018_p6 }
  0x33   :  { %p1021_p9 = pnand %p1020_p8, %p1014_p5 }
  0x35   :  { %1024 = shalt.err (!%p1021_p9)
}
  0x36   :  { %31 = dma.hbm_to_vmem [thread:$0]  %s1299_s1, 256, %s26_s11, [#allocation4], %s1077_s18, %s1077_s18, %s1078_s19  }
  0x37   :  { %s1025_s25 = scalar_lea.hbm %s1302_s4, 256 }
  0x38   :  { %p1026_p10 = scmp.ne.s32.totalorder %s1302_s4, %s1025_s25  ;;  %p1029_p11 = scmp.lt.u32.totalorder %s1025_s25, %s1302_s4 }
  0x3a   :  { %p1031_p12 = pnand %p1029_p11, %p1026_p10 }
  0x3c   :  { %1034 = shalt.err (!%p1031_p12)
}
  0x3d   :  { %s1035_s3 = scalar_lea.vmem %s1171_s13, 256  ;;  %p1040_p0 = scmp.lt.s32.totalorder %s1171_s13, %s1171_s13 }
  0x3e   :  { %p1036_p13 = scmp.ne.s32.totalorder %s1171_s13, %s1035_s3  ;;  %p1041_p1 = scmp.lt.s32.totalorder %s1035_s3, %s1035_s3 }
  0x40   :  { %p1042_p2 = por %p1041_p1, %p1040_p0 }
  0x42   :  { %p1043_p3 = pnand %p1042_p2, %p1036_p13 }
  0x44   :  { %1046 = shalt.err (!%p1043_p3)
}
  0x45   :  { %57 = dma.hbm_to_vmem [thread:$0]  %s1302_s4, 256, %s1171_s13, [#allocation6], %s1077_s18, %s1077_s18, %s1078_s19  }
  0x46   :  { %s1081_s9 = smov [#allocation10]   ;;  %s1047_s15 = scalar_lea.hbm %s1304_s6, 512 }
  0x47   :  { %s75_s11 = sshll.u32 %s1081_s9, 4  ;;  %p1048_p4 = scmp.ne.s32.totalorder %s1304_s6, %s1047_s15  ;;  %s76_s11 = int_to_ptr.vmem [resolvable:$true] %s75_s11 }
  0x48   :  { %p1051_p5 = scmp.lt.u32.totalorder %s1047_s15, %s1304_s6 }
  0x4a   :  { %p1053_p6 = pnand %p1051_p5, %p1048_p4 }
  0x4c   :  { %1056 = shalt.err (!%p1053_p6)
}
  0x4d   :  { %s1057_s21 = scalar_lea.vmem %s76_s11, 512  ;;  %p1062_p8 = scmp.lt.s32.totalorder %s76_s11, %s76_s11 }
  0x4e   :  { %p1058_p7 = scmp.ne.s32.totalorder %s76_s11, %s1057_s21  ;;  %p1063_p9 = scmp.lt.s32.totalorder %s1057_s21, %s1057_s21 }
  0x50   :  { %p1064_p10 = por %p1063_p9, %p1062_p8 }
  0x52   :  { %p1065_p11 = pnand %p1064_p10, %p1058_p7 }
  0x54   :  { %1068 = shalt.err (!%p1065_p11)
}
  0x55   :  { %s1082_s4 = smov 128   ;;  %s1083_s18 = smov 8  }
  0x56   :  { %81 = dma.hbm_to_vmem [thread:$0]  %s1304_s6, 512, %s76_s11, [#allocation9], %s1082_s4, %s1082_s4, %s1083_s18  }
  0x57   :  { %1069 = dma.done.wait [#allocation4], 256  }
  0x58   :  { %1070 = vsyncadd [#allocation4], 4294967040 }
  0x59   :  { %1071 = dma.done.wait [#allocation6], 1280  }
  0x5a   :  { %1072 = vsyncadd [#allocation6], 4294966016 }
  0x5b   :  { %1073 = dma.done.wait [#allocation9], 768  }
  0x5c   :  { %1074 = vsyncadd [#allocation9], 4294966528  ;;  %vm122_vm0 = vcmask 1043456   ;;  %vm115_vm1 = vcmask 64512   ;;  %v100_v1 = vld [vmem:[%s1298_s0] sm:$0xf]  ;;  %v389_v54 = vlaneseq }
  0x5d   :  { %933 = vmatprep.subr.msk.bf16.mxu0 %vm122_vm0, %v100_v1  ;;  %v124_v2 = vsel %vm122_vm0, %v100_v1, 0  ;;  %v947_v3 = vld [vmem:[#allocation3] sm:$0xff]   ;;  %v948_v4 = vld [vmem:[#allocation3 + $0x8] sm:$0xff]   ;;  %v1084_v5 = vmov 0   ;;  %vm235_vm2 = vcmask 261120   ;;  %v776_v27 = vld [vmem:[#allocation10] sm:$0xff] }
  0x5e   :  { %888 = vmatpush3.bf16.msra.mxu0 %v124_v2  ;;  %889 = vmatprep.mubr.msk.bf16.mxu0 %vm115_vm1, %v947_v3  ;;  %v949_v6 = vld [vmem:[%s1300_s2] sm:$0xff]   ;;  %v365_v7 = vld [vmem:[#allocation5] sm:$0xf]  ;;  %v367_v8 = vld [vmem:[#allocation5 + $0x8] sm:$0xf]  ;;  %v1259_v56 = vshrl.u32 %v389_v54, 7 }
  0x5f   :  { %945 = vset.pattern.permute.xlu0 %v1084_v5  ;;  %946 = vset.pattern.permute.xlu1 %v1084_v5  ;;  %v366_v9 = vld [vmem:[#allocation5 + $0x4] sm:$0xf]  ;;  %v368_v10 = vld [vmem:[#allocation5 + $0xc] sm:$0xf]  ;;  %v369_v11 = vld [vmem:[#allocation5 + $0x10] sm:$0xf] }
  0x60   :  { %897 = vmatprep.mubr.msk.bf16.mxu1 %vm235_vm2, %v949_v6  ;;  %383 = vperm.xlu0 %945, %v365_v7   ;;  %v370_v12 = vld [vmem:[#allocation5 + $0x14] sm:$0xf]  ;;  %v371_v13 = vld [vmem:[#allocation5 + $0x18] sm:$0xf]  ;;  %v372_v14 = vld [vmem:[#allocation5 + $0x1c] sm:$0xf] }
  0x61   :  { %890 = vmatmul.mubr.msk.bf16.vlgmr.msra.gmra.mrb[0].mxu0 %vm115_vm1, %v948_v4  ;;  %407 = vperm.xlu1 %946, %v367_v8   ;;  %v373_v15 = vld [vmem:[#allocation5 + $0x20] sm:$0xf]  ;;  %v374_v16 = vld [vmem:[#allocation5 + $0x24] sm:$0xf]  ;;  %v375_v17 = vld [vmem:[#allocation5 + $0x28] sm:$0xf] }
  0x62   :  { %v376_v18 = vld [vmem:[#allocation5 + $0x2c] sm:$0xf]  ;;  %v377_v19 = vld [vmem:[#allocation5 + $0x30] sm:$0xf]  ;;  %v378_v20 = vld [vmem:[#allocation5 + $0x34] sm:$0xf] }
  0x63   :  { %v379_v21 = vld [vmem:[#allocation5 + $0x38] sm:$0xf]  ;;  %v380_v22 = vld [vmem:[#allocation5 + $0x3c] sm:$0xf]  ;;  %v704_v23 = vld [vmem:[#allocation8] sm:$0xf] }
  0x64   :  { %395 = vperm.xlu0 %945, %v366_v9   ;;  %v705_v24 = vld [vmem:[#allocation8 + $0x4] sm:$0xf]  ;;  %v706_v25 = vld [vmem:[#allocation8 + $0x8] sm:$0xf]  ;;  %v707_v26 = vld [vmem:[#allocation8 + $0xc] sm:$0xf] }
  0x65   :  { %419 = vperm.xlu1 %946, %v368_v10   ;;  %v777_v28 = vld [vmem:[#allocation10 + $0x8] sm:$0xff]  ;;  %v778_v29 = vld [vmem:[#allocation10 + $0x10] sm:$0xff]  ;;  %v779_v30 = vld [vmem:[#allocation10 + $0x18] sm:$0xff]  ;;  %v1085_v52 = vmov 839922192  }
  0x66   :  { %v813_v31 = vld [vmem:[#allocation2] sm:$0x1]  ;;  %v950_v40 = vld [vmem:[%s1300_s2 + $0x8] sm:$0xff]   ;;  %v951_v41 = vld [vmem:[%s1300_s2 + $0x10] sm:$0xff]   ;;  %v387_v53 = vunpack.c.l.s4 %v1085_v52 }
  0x67   :  { %v952_v42 = vld [vmem:[%s1300_s2 + $0x18] sm:$0xff]   ;;  %v953_v43 = vld [vmem:[%s1300_s2 + $0x20] sm:$0xff]   ;;  %v954_v44 = vld [vmem:[%s1300_s2 + $0x28] sm:$0xff]  }
  0x68   :  { %431 = vperm.xlu0 %945, %v369_v11   ;;  %v955_v45 = vld [vmem:[%s1300_s2 + $0x30] sm:$0xff]   ;;  %v956_v46 = vld [vmem:[%s1300_s2 + $0x38] sm:$0xff]   ;;  %v388_v55 = vunpack.c.0.s8 %v387_v53 }
  0x69   :  { %443 = vperm.xlu1 %946, %v370_v12   ;;  %v957_v47 = vld [vmem:[#allocation7] sm:$0xff]  }
  0x6a   :  { %929 = vmatprep.mubr.bf16.mxu0 %v957_v47  ;;  %v1262_v59 = vsub.s32 %v388_v55, %v1259_v56 }
  0x6c   :  { %455 = vperm.xlu0 %945, %v371_v13  }
  0x6d   :  { %467 = vperm.xlu1 %946, %v372_v14  }
  0x70   :  { %479 = vperm.xlu0 %945, %v373_v15  }
  0x71   :  { %491 = vperm.xlu1 %946, %v374_v16  }
  0x74   :  { %503 = vperm.xlu0 %945, %v375_v17  }
  0x75   :  { %515 = vperm.xlu1 %946, %v376_v18  }
  0x78   :  { %527 = vperm.xlu0 %945, %v377_v19  }
  0x79   :  { %539 = vperm.xlu1 %946, %v378_v20  }
  0x7c   :  { %551 = vperm.xlu0 %945, %v379_v21  }
  0x7d   :  { %563 = vperm.xlu1 %946, %v380_v22  }
  0x80   :  { %710 = vperm.xlu0 %945, %v704_v23  }
  0x81   :  { %722 = vperm.xlu1 %946, %v705_v24  }
  0x84   :  { %734 = vperm.xlu0 %945, %v706_v25  }
  0x85   :  { %746 = vperm.xlu1 %946, %v707_v26  }
  0x88   :  { %782 = vperm.xlu0 %945, %v776_v27  }
  0x89   :  { %787 = vperm.xlu1 %946, %v777_v28  }
  0x8c   :  { %792 = vperm.xlu0 %945, %v778_v29  }
  0x8d   :  { %797 = vperm.xlu1 %946, %v779_v30  }
  0x90   :  { %816 = vperm.xlu0 %945, %v813_v31  }
  0xdf   :  { %v384_v48 = vpop.permute.xlu0 %383 }
  0xe0   :  { %v408_v49 = vpop.permute.xlu1 %407  ;;  %v392_v0 = vrot.slane %v384_v48, %v1262_v59 }
  0xe1   :  { %v416_v60 = vrot.slane %v408_v49, %v1262_v59 }
  0xe3   :  { %v396_v50 = vpop.permute.xlu0 %395 }
  0xe4   :  { %v420_v51 = vpop.permute.xlu1 %419  ;;  %v404_v1 = vrot.slane %v396_v50, %v1262_v59 }
  0xe5   :  { %v428_v61 = vrot.slane %v420_v51, %v1262_v59 }
  0xe6   :  { %v852_v9 = vcombine.low %v392_v0, %v404_v1 }
  0xe7   :  { %v432_v57 = vpop.permute.xlu0 %431  ;;  %v853_v4 = vcombine.low %v416_v60, %v428_v61 }
  0xe8   :  { %v444_v58 = vpop.permute.xlu1 %443  ;;  %v440_v15 = vrot.slane %v432_v57, %v1262_v59 }
  0xe9   :  { %v452_v17 = vrot.slane %v444_v58, %v1262_v59 }
  0xeb   :  { %v456_v62 = vpop.permute.xlu0 %455  ;;  %v854_v28 = vcombine.low %v440_v15, %v452_v17 }
  0xec   :  { %v468_v63 = vpop.permute.xlu1 %467  ;;  %v464_v16 = vrot.slane %v456_v62, %v1262_v59 }
  0xed   :  { %v476_v18 = vrot.slane %v468_v63, %v1262_v59 }
  0xef   :  { %v480_v10 = vpop.permute.xlu0 %479  ;;  %v855_v29 = vcombine.low %v464_v16, %v476_v18 }
  0xf0   :  { %v492_v12 = vpop.permute.xlu1 %491 }
  0xf3   :  { %v504_v22 = vpop.permute.xlu0 %503 }
  0xf4   :  { %v516_v25 = vpop.permute.xlu1 %515 }
 0x134   :  { %v891_v32 = vpop.f32.mrb[0].mxu0 }
 0x135   :  { %v160_v33 = vpop.f32.mrb[1].mxu0 }
 0x136   :  { %v892_v34 = vpop.f32.mrb[2].mxu0 }
 0x137   :  { %v176_v35 = vpack.c.bf16 %v892_v34, %v891_v32  ;;  %v163_v36 = vpop.f32.mrb[3].mxu0  ;;  %v512_v34 = vrot.slane %v504_v22, %v1262_v59 }
 0x138   :  { %v175_v37 = vpack.c.bf16 %v163_v36, %v160_v33  ;;  %v488_v33 = vrot.slane %v480_v10, %v1262_v59  ;;  %v528_v36 = vpop.permute.xlu0 %527  ;;  %v958_v10 = vld [vmem:[#allocation7 + $0x8] sm:$0xff]  }
 0x139   :  { %v178_v39 = vmax.bf16 %v1084_v5, %v176_v35  ;;  %v500_v35 = vrot.slane %v492_v12, %v1262_v59  ;;  %v536_v51 = vrot.slane %v528_v36, %v1262_v59 }
 0x13a   :  { %v177_v38 = vmax.bf16 %v1084_v5, %v175_v37  ;;  %v524_v37 = vrot.slane %v516_v25, %v1262_v59 }
 0x13c   :  { %893 = vmatprep.subr.bf16.mxu1 %v177_v38  ;;  %v857_v47 = vcombine.low %v512_v34, %v524_v37  ;;  %v552_v52 = vpop.permute.xlu0 %551 }
 0x13d   :  { %894 = vmatpush3.bf16.msra.mxu1 %v177_v38  ;;  %v560_v54 = vrot.slane %v552_v52, %v1262_v59 }
 0x13e   :  { %895 = vmatprep.subr.bf16.mxu1 %v178_v39 }
 0x141   :  { %896 = vmatpush3.bf16.msra.mxu1 %v178_v39 }
 0x144   :  { %898 = vmatmul.mubr.msk.bf16.vlgmr.msra.gmra.mrb[0].mxu1 %vm235_vm2, %v950_v40  ;;  %v540_v40 = vpop.permute.xlu1 %539 }
 0x145   :  { %901 = vmatprep.mubr.msk.bf16.mxu1 %vm235_vm2, %v951_v41  ;;  %v548_v55 = vrot.slane %v540_v40, %v1262_v59 }
 0x148   :  { %v564_v53 = vpop.permute.xlu1 %563 }
 0x149   :  { %v572_v57 = vrot.slane %v564_v53, %v1262_v59 }
 0x14c   :  { %902 = vmatmul.mubr.msk.bf16.gmra.mrb[4].mxu1 %vm235_vm2, %v952_v42  ;;  %v723_v12 = vpop.permute.xlu1 %722 }
 0x14d   :  { %905 = vmatprep.mubr.msk.bf16.mxu1 %vm235_vm2, %v953_v43  ;;  %v731_v18 = vrot.slane %v723_v12, %v1262_v59 }
 0x154   :  { %906 = vmatmul.mubr.msk.bf16.gmra.mrb[8].mxu1 %vm235_vm2, %v954_v44 }
 0x155   :  { %909 = vmatprep.mubr.msk.bf16.mxu1 %vm235_vm2, %v955_v45 }
 0x15c   :  { %910 = vmatmul.mubr.msk.bf16.gmra.mrb[12].mxu1 %vm235_vm2, %v956_v46  ;;  %v856_v46 = vcombine.low %v488_v33, %v500_v35 }
 0x217   :  { %v899_v2 = vpop.f32.mrb[0].mxu1 }
 0x218   :  { %v294_v3 = vpop.f32.mrb[1].mxu1 }
 0x219   :  { %v900_v6 = vpop.f32.mrb[2].mxu1 }
 0x21a   :  { %v358_v7 = vpack.c.bf16 %v900_v6, %v899_v2  ;;  %v297_v8 = vpop.f32.mrb[3].mxu1  ;;  %v858_v2 = vcombine.low %v536_v51, %v548_v55 }
 0x21b   :  { %v357_v11 = vpack.c.bf16 %v297_v8, %v294_v3  ;;  %v859_v3 = vcombine.low %v560_v54, %v572_v57 }
 0x21c   :  { %v622_v13 = vadd.bf16 %v853_v4, %v358_v7 }
 0x21d   :  { %v621_v14 = vadd.bf16 %v852_v9, %v357_v11  ;;  %v711_v11 = vpop.permute.xlu0 %710 }
 0x21e   :  { %v630_v24 = vmax.bf16 %v1084_v5, %v622_v13  ;;  %v719_v17 = vrot.slane %v711_v11, %v1262_v59 }
 0x21f   :  { %v903_v19 = vpop.f32.mrb[4].mxu1  ;;  %v629_v20 = vmax.bf16 %v1084_v5, %v621_v14  ;;  %v747_v14 = vpop.permute.xlu1 %746 }
 0x220   :  { %v310_v21 = vpop.f32.mrb[5].mxu1  ;;  %v755_v16 = vrot.slane %v747_v14, %v1262_v59  ;;  %v862_v25 = vcombine.low %v719_v17, %v731_v18 }
 0x221   :  { %v904_v23 = vpop.f32.mrb[6].mxu1  ;;  %913 = vmatprep.subr.bf16.mxu0 %v629_v20  ;;  %v735_v13 = vpop.permute.xlu0 %734 }
 0x222   :  { %v360_v26 = vpack.c.bf16 %v904_v23, %v903_v19  ;;  %v313_v27 = vpop.f32.mrb[7].mxu1  ;;  %914 = vmatpush3.bf16.msra.mxu0 %v629_v20  ;;  %v743_v15 = vrot.slane %v735_v13, %v1262_v59 }
 0x223   :  { %v359_v30 = vpack.c.bf16 %v313_v27, %v310_v21  ;;  %915 = vmatprep.subr.bf16.mxu0 %v630_v24 }
 0x224   :  { %v624_v31 = vadd.bf16 %v855_v29, %v360_v26  ;;  %v863_v22 = vcombine.low %v743_v15, %v755_v16 }
 0x225   :  { %v623_v32 = vadd.bf16 %v854_v28, %v359_v30  ;;  %v783_v29 = vpop.permute.xlu0 %782 }
 0x226   :  { %916 = vmatpush3.bf16.msra.mxu0 %v630_v24  ;;  %v632_v43 = vmax.bf16 %v1084_v5, %v624_v31 }
 0x227   :  { %v907_v38 = vpop.f32.mrb[8].mxu1  ;;  %v631_v39 = vmax.bf16 %v1084_v5, %v623_v32  ;;  %v788_v32 = vpop.permute.xlu1 %787 }
 0x228   :  { %v326_v41 = vpop.f32.mrb[9].mxu1 }
 0x229   :  { %v908_v42 = vpop.f32.mrb[10].mxu1  ;;  %917 = vmatprep.subr.bf16.mxu0 %v631_v39 }
 0x22a   :  { %v362_v44 = vpack.c.bf16 %v908_v42, %v907_v38  ;;  %v329_v45 = vpop.f32.mrb[11].mxu1  ;;  %918 = vmatpush3.bf16.msra.mxu0 %v631_v39  ;;  %v793_v38 = vpop.permute.xlu0 %792 }
 0x22b   :  { %v361_v48 = vpack.c.bf16 %v329_v45, %v326_v41  ;;  %919 = vmatprep.subr.bf16.mxu0 %v632_v43  ;;  %v798_v41 = vpop.permute.xlu1 %797 }
 0x22c   :  { %v626_v49 = vadd.bf16 %v857_v47, %v362_v44 }
 0x22d   :  { %v625_v50 = vadd.bf16 %v856_v46, %v361_v48  ;;  %v821_v48 = vsub.s32 0, %v1259_v56 }
 0x22e   :  { %920 = vmatpush3.bf16.msra.mxu0 %v632_v43  ;;  %v634_v63 = vmax.bf16 %v1084_v5, %v626_v49  ;;  %v817_v49 = vpop.permute.xlu0 %816 }
 0x22f   :  { %v911_v58 = vpop.f32.mrb[12].mxu1  ;;  %v633_v60 = vmax.bf16 %v1084_v5, %v625_v50  ;;  %v822_v51 = vrot.slane %v817_v49, %v821_v48 }
 0x230   :  { %v342_v61 = vpop.f32.mrb[13].mxu1 }
 0x231   :  { %v912_v62 = vpop.f32.mrb[14].mxu1  ;;  %921 = vmatprep.subr.bf16.mxu0 %v633_v60 }
 0x232   :  { %v364_v0 = vpack.c.bf16 %v912_v62, %v911_v58  ;;  %v345_v1 = vpop.f32.mrb[15].mxu1  ;;  %922 = vmatpush3.bf16.msra.mxu0 %v633_v60 }
 0x233   :  { %v363_v4 = vpack.c.bf16 %v345_v1, %v342_v61  ;;  %923 = vmatprep.subr.bf16.mxu0 %v634_v63 }
 0x234   :  { %v628_v6 = vadd.bf16 %v859_v3, %v364_v0 }
 0x235   :  { %v627_v7 = vadd.bf16 %v858_v2, %v363_v4 }
 0x236   :  { %924 = vmatpush3.bf16.msra.mxu0 %v634_v63  ;;  %v636_v9 = vmax.bf16 %v1084_v5, %v628_v6 }
 0x237   :  { %v635_v8 = vmax.bf16 %v1084_v5, %v627_v7 }
 0x239   :  { %925 = vmatprep.subr.bf16.mxu0 %v635_v8 }
 0x23a   :  { %926 = vmatpush3.bf16.msra.mxu0 %v635_v8 }
 0x23b   :  { %927 = vmatprep.subr.bf16.mxu0 %v636_v9 }
 0x23e   :  { %928 = vmatpush3.bf16.msra.mxu0 %v636_v9 }
 0x241   :  { %930 = vmatmul.mubr.bf16.vlgmr.msra.gmra.mrb[4].mxu0 %v958_v10 }
 0x314   :  { %v931_v19 = vpop.f32.mrb[4].mxu0 }
 0x315   :  { %v687_v20 = vpop.f32.mrb[5].mxu0 }
 0x316   :  { %v932_v21 = vpop.f32.mrb[6].mxu0 }
 0x317   :  { %v703_v23 = vpack.c.bf16 %v932_v21, %v931_v19  ;;  %v690_v24 = vpop.f32.mrb[7].mxu0 }
 0x318   :  { %v702_v26 = vpack.c.bf16 %v690_v24, %v687_v20 }
 0x319   :  { %v769_v27 = vadd.bf16 %v863_v22, %v703_v23 }
 0x31a   :  { %v768_v28 = vadd.bf16 %v862_v25, %v702_v26 }
 0x31b   :  { %v771_v30 = vmax.bf16 %v1084_v5, %v769_v27 }
 0x31c   :  { %v770_v31 = vmax.bf16 %v1084_v5, %v768_v28 }
 0x31d   :  { %v774_v33 = vunpack.c.l.bf16 %v771_v30  ;;  %v775_v59 = vunpack.c.h.bf16 %v771_v30 }
 0x31e   :  { %v772_v34 = vunpack.c.l.bf16 %v770_v31  ;;  %v773_v35 = vunpack.c.h.bf16 %v770_v31 }
 0x31f   :  { %v802_v39 = vmul.f32 %v793_v38, %v774_v33  ;;  %v803_v42 = vmul.f32 %v798_v41, %v775_v59 }
 0x320   :  { %v800_v36 = vmul.f32 %v783_v29, %v772_v34  ;;  %v801_v37 = vmul.f32 %v788_v32, %v773_v35 }
 0x322   :  { %v804_v40 = vadd.f32 %v801_v37, %v800_v36 }
 0x324   :  { %v805_v43 = vadd.f32 %v804_v40, %v802_v39 }
 0x326   :  { %v806_v44 = vadd.f32 %v805_v43, %v803_v42 }
 0x328   :  { %v807_v45 = vrot.slane %v806_v44, 4 }
 0x32a   :  { %v808_v46 = vadd.f32 %v807_v45, %v806_v44 }
 0x32c   :  { %v809_v47 = vrot.slane %v808_v46, 2 }
 0x32e   :  { %v810_v5 = vadd.f32 %v809_v47, %v808_v46 }
 0x330   :  { %v811_v50 = vrot.slane %v810_v5, 1 }
 0x332   :  { %v812_v52 = vadd.f32 %v811_v50, %v810_v5 }
 0x334   :  { %v823_v53 = vadd.f32 %v822_v51, %v812_v52 }
 0x336   :  { %824 = vst [vmem:[%s1306_s8] sm:$0x1] %v823_v53 }
 0x337   :  { %829 = vsyncpa [#allocation4], 1 }
 0x338   :  { %830 = vsyncpa [#allocation6], 1 }
 0x339   :  { %831 = vsyncpa [#allocation9], 1 }

</bundles_post_ra>
